<compile_context>
chip_gen: v6e
topology: v6e:2x2x1
jax: 0.10.0
libtpu: 0.0.40
codegen_flags: <defaults>
</compile_context>

<pallas_src>
import jax
import jax.numpy as jnp
from jax.experimental import pallas as pl
from jax.experimental.pallas import tpu as pltpu


def _drop_path_kernel(scale_ref, x_ref, o_ref):
    """o = x * scale[b] for the current sample's tile.

    scale_ref: (B,) float32 in SMEM -- per-sample keep/drop scale.
    x_ref/o_ref: (1, TN, C) VMEM tile of sample b.
    """
    b = pl.program_id(0)
    s = scale_ref[b]
    o_ref[...] = (x_ref[...].astype(jnp.float32) * s).astype(o_ref.dtype)


def drop_path(x, key, drop_prob: float = 0.0, training: bool = False,
              scale_by_keep: bool = True, *, block_bytes: int = 2 << 20):
    """Pallas equivalent of `drop_path` / `DropPath.forward`.

    Args:
      x: (B, ...) activation tensor (typically (B, N, C)).
      key: jax PRNG key used for the per-sample Bernoulli draw.
      drop_prob, training, scale_by_keep: as in the PyTorch module.
    Returns:
      Array with the same shape/dtype as x.
    """
    # Identity fast path: no kernel launch, no data movement at all.
    if drop_prob == 0.0 or not training:
        return x

    keep_prob = 1.0 - drop_prob
    B = x.shape[0]

    # Per-sample Bernoulli mask: only B scalars, generated in plain JAX.
    # TODO(synk): torch's bernoulli_ RNG stream cannot be reproduced
    # bit-exactly; the semantics (Bernoulli(keep_prob) per sample, optional
    # 1/keep_prob scaling) are identical.
    mask = jax.random.bernoulli(key, p=keep_prob, shape=(B,)).astype(jnp.float32)
    if keep_prob > 0.0 and scale_by_keep:
        scale = mask / keep_prob
    else:
        scale = mask

    # Normalize to (B, N, C) for tiling; restore the original shape at the end.
    orig_shape = x.shape
    if x.ndim >= 3:
        x3 = x.reshape(B, -1, x.shape[-1])
    else:
        x3 = x.reshape(B, 1, -1)
    _, N, C = x3.shape

    # Tile the sequence axis so each block is ~block_bytes (big enough to hit
    # ~85%+ of HBM roofline per measured tiled-copy numbers; small enough that
    # double-buffered in+out stays far under the VMEM limit on every chip).
    itemsize = jnp.dtype(x3.dtype).itemsize
    rows_per_block = max(8, block_bytes // max(1, C * itemsize))
    if rows_per_block >= N:
        tn = N                                # full axis -> no (8,) constraint
    else:
        tn = max(8, (rows_per_block // 8) * 8)  # second-minor dim: multiple of 8
    grid = (B, pl.cdiv(N, tn))

    out = pl.pallas_call(
        _drop_path_kernel,
        out_shape=jax.ShapeDtypeStruct((B, N, C), x3.dtype),
        grid=grid,
        in_specs=[
            # Per-sample scales: tiny, untiled, live in SMEM.
            pl.BlockSpec(memory_space=pltpu.MemorySpace.SMEM),
            # x tile: one sample, TN rows, full (lane-dense) channel dim.
            pl.BlockSpec((1, tn, C), lambda b, j: (b, j, 0)),
        ],
        out_specs=pl.BlockSpec((1, tn, C), lambda b, j: (b, j, 0)),
        compiler_params=pltpu.CompilerParams(
            dimension_semantics=("parallel", "parallel"),
            vmem_limit_bytes=32 * 1024 * 1024,
        ),
    )(scale, x3)
    return out.reshape(orig_shape)


if __name__ == "__main__":
    key = jax.random.PRNGKey(0)
    kx, kmask = jax.random.split(key)

    # Small shapes consistent with typical DropPath usage in a transformer
    # block: batch=2, seq=8, hidden=32.
    B, N, C = 2, 8, 32
    x = jax.random.normal(kx, (B, N, C), dtype=jnp.float32)
    drop_prob = 0.3

    # 1) Eval / drop_prob=0 path: identity with zero data movement.
    y_eval = drop_path(x, kmask, drop_prob=drop_prob, training=False)
    assert y_eval.shape == x.shape and bool(jnp.all(y_eval == x))
    y_p0 = drop_path(x, kmask, drop_prob=0.0, training=True)
    assert bool(jnp.all(y_p0 == x))

    # 2) Training path: per-sample mask + 1/keep_prob scaling via the kernel.
    y = drop_path(x, kmask, drop_prob=drop_prob, training=True, scale_by_keep=True)
    jax.block_until_ready(y)

    # Reference (same PRNG key -> same per-sample mask).
    keep_prob = 1.0 - drop_prob
    ref_mask = jax.random.bernoulli(kmask, p=keep_prob, shape=(B,)).astype(jnp.float32)
    ref = x * (ref_mask / keep_prob)[:, None, None]
    assert y.shape == x.shape and y.dtype == x.dtype
    assert bool(jnp.allclose(y, ref, atol=1e-6, rtol=1e-6))

    # 3) scale_by_keep=False path (mask only, no 1/keep_prob rescale).
    y_nr = drop_path(x, kmask, drop_prob=drop_prob, training=True, scale_by_keep=False)
    jax.block_until_ready(y_nr)
    ref_nr = x * ref_mask[:, None, None]
    assert bool(jnp.allclose(y_nr, ref_nr, atol=1e-6, rtol=1e-6))

    print("KERNEL_OK")
</pallas_src>

<mosaic_0001>
module attributes {stable_mosaic.version = 11 : i64} {
  func.func @_drop_path_kernel(%arg0: i32, %arg1: i32, %arg2: memref<2xf32, #tpu.memory_space<smem>>, %arg3: memref<1x8x32xf32, #tpu.memory_space<vmem>>, %arg4: memref<1x8x32xf32, #tpu.memory_space<vmem>>) attributes {dimension_semantics = [#tpu.dimension_semantics<parallel>, #tpu.dimension_semantics<parallel>], iteration_bounds = array<i64: 2, 1>, scalar_prefetch = 0 : i64, scratch_operands = 0 : i64, tpu.core_type = #tpu.core_type<tc>, window_params = [{transform_indices = @transform_0, window_bounds = array<i64: 2>}, {transform_indices = @transform_1, window_bounds = array<i64: 1, 8, 32>}, {transform_indices = @transform_2, window_bounds = array<i64: 1, 8, 32>}]} {
    %0 = arith.index_cast %arg0 : i32 to index
    %1 = memref.load %arg2[%0] : memref<2xf32, #tpu.memory_space<smem>>
    %c0 = arith.constant 0 : index
    %c0_0 = arith.constant 0 : index
    %c0_1 = arith.constant 0 : index
    %2 = vector.load %arg3[%c0, %c0_0, %c0_1] : memref<1x8x32xf32, #tpu.memory_space<vmem>>, vector<1x8x32xf32>
    %3 = vector.broadcast %1 : f32 to vector<1x8x32xf32>
    %4 = arith.mulf %2, %3 : vector<1x8x32xf32>
    %c0_2 = arith.constant 0 : index
    %c0_3 = arith.constant 0 : index
    %c0_4 = arith.constant 0 : index
    %5 = vector.load %arg4[%c0_2, %c0_3, %c0_4] : memref<1x8x32xf32, #tpu.memory_space<vmem>>, vector<1x8x32xf32>
    tpu.vector_store %arg4[%c0_2, %c0_3, %c0_4], %4 {strides = array<i32>} : memref<1x8x32xf32, #tpu.memory_space<vmem>>, vector<1x8x32xf32>,
    return
  }
  func.func @transform_0(%arg0: i32, %arg1: i32) -> i32 {
    %c0_i32 = arith.constant 0 : i32
    %c0_i32_0 = arith.constant 0 : i32
    return %c0_i32 : i32
  }
  func.func @transform_1(%arg0: i32, %arg1: i32) -> (i32, i32, i32) {
    %c0_i32 = arith.constant 0 : i32
    %c0_i32_0 = arith.constant 0 : i32
    return %arg0, %arg1, %c0_i32 : i32, i32, i32
  }
  func.func @transform_2(%arg0: i32, %arg1: i32) -> (i32, i32, i32) {
    %c0_i32 = arith.constant 0 : i32
    %c0_i32_0 = arith.constant 0 : i32
    return %arg0, %arg1, %c0_i32 : i32, i32, i32
  }
}

</mosaic_0001>

<bundles_post_ra>
// kernel: tpu_custom_call.1
= control target key start
LH: loop header
LB: loop body
LE: loop exit
PB: predicated region body
PF: predicated region fallthrough
CT: control target
= control target key end

     0   :  { %7 = vsyncpa [#allocation5], 0  ;;  %s692_s0 = inlined_call_operand.hbm [shape: f32[2], index: 0, kind: input, shape index: {}]   ;;  %s693_s1 = inlined_call_operand.hbm [shape: f32[2,8,32], index: 1, kind: input, shape index: {}]   ;;  %s694_s2 = inlined_call_operand.hbm [shape: f32[2,8,32], index: 2, kind: output, shape index: {}]  }
   0x1   :  { %8 = vsyncpa [#allocation3], 0 }
   0x2   :  { %10 = vsyncpa [#allocation3 + $0x1], 0 }
   0x3   :  { %11 = vsyncpa [#allocation4], 0 }
   0x4   :  { %13 = vsyncpa [#allocation4 + $0x1], 0  ;;  %s532_s9 = smov 0   ;;  %s534_s10 = smov 0  }
   0x5   :  { %s536_s11 = smov 0   ;;  %s538_s12 = smov 0  }
   0x6   :  { %s540_s13 = smov 0   ;;  %s542_s14 = smov 0  }
   0x7 LB: > { %s301_s15 = sadd.s32 4294967295, %s512_s14   ;;  %s302_s16 = sadd.s32 4294967294, %s512_s14   ;;  %s512_s14 = sphi %s542_s14, %s19_s14   ;;  %s508_s13 = sphi %s540_s13, %s711_s13   ;;  %s504_s12 = sphi %s538_s12, %s710_s12   ;;  %s500_s11 = sphi %s536_s11, %s709_s11   ;;  %s496_s10 = sphi %s534_s10, %s708_s10   ;;  %s492_s9 = sphi %s532_s9, %s707_s9  }
   0x8   : > { %p74_p0 = scmp.ne.s32.totalorder %s496_s10, %s492_s9  ;;  %p566_p1 = scmp.eq.s32.totalorder %s301_s15, 0 }
   0x9   : > { %p570_p2 = scmp.eq.s32.totalorder %s301_s15, 1  ;;  %p106_p3 = scmp.eq.s32.totalorder %s302_s16, 1 }
   0xa   : > { %p576_p4 = por %p566_p1, %p74_p0  ;;  %p303_p5 = scmp.ge.s32.totalorder %s512_s14, 1 }
   0xb   : > { %p581_p6 = por %p106_p3, %p74_p0  ;;  %p113_p7 = scmp.lt.s32.totalorder %s512_s14, 3 }
   0xc   : > { %s31_s22 = sadd.s32 1, %s508_s13  ;;  %s61_s23 = sadd.s32 1, %s500_s11 }
   0xd   : > { %s699_s20 = scalar_select %p581_p6, 1, 0 }
   0xe   : > { %p586_p8 = pnand %p303_p5, %p113_p7  ;;  %p33_p12 = scmp.ge.s32.totalorder %s31_s22, 2 }
   0xf   : > { %p68_p13 = scmp.ne.s32.totalorder %s500_s11, %s496_s10  ;;  %p69_p0 = scmp.eq.s32.totalorder %s512_s14, 0 }
  0x10   : > { %p324_p10 = pneg %p586_p8  ;;  %s514_s24 = smov [#allocation2]  }
  0x11   : > { %s713_s22 = smov (%p33_p12, %s31_s22), 0  ;;  %p605_p3 = por %p69_p0, %p68_p13 }
  0x12   : > { %p325_p11 = pnand %p324_p10, %p566_p1  ;;  %p611_p5 = por %p570_p2, %p68_p13 }
  0x13   : > { %s56_s29 = ssub.s32 %s508_s13, %s713_s22  ;;  %p337_p7 = scmp.lt.s32.totalorder %s512_s14, 2 }
  0x14   : > { %327 = dma.hbm_to_smem (!%p325_p11), %s692_s0, 16, %s514_s24, [#allocation5]  }
  0x15   : > { %s702_s28 = scalar_select %p611_p5, 1, 0 }
  0x16   : > { %p59_p10 = scmp.eq.s32.totalorder %s56_s29, 0  ;;  %s135_s30 = sand.u32 1, %s500_s11  }
  0x17   : > { %s306_s3 = sshll.u32 %s135_s30, 3  ;;  %s307_s5 = sshll.u32 %s508_s13, 7 }
  0x18   : > { %s620_s4 = scalar_select %p59_p10, %s500_s11, %s61_s23  }
  0x19   : > { %s145_s8 = scalar_lea.hbm %s693_s1, %s307_s5  ;;  %s139_s15 = scalar_lea.vmem [#allocation6], %s306_s3 }
  0x1a   : > { %s147_s16 = sshll.u32 %s139_s15, 4  ;;  %p628_p2 = pnand %p337_p7, %p605_p3  ;;  %s148_s16 = int_to_ptr.vmem [resolvable:$true] %s147_s16 }
  0x1b   : > { %s136_s24 = scalar_lea.sflag [#allocation3], %s135_s30  ;;  %s413_s25 = scalar_lea.vmem %s148_s16, 128 }
  0x1c   : > { %p402_p11 = pneg %p628_p2  ;;  %p414_p12 = scmp.ne.s32.totalorder %s148_s16, %s413_s25 }
  0x1d   : > { %s515_s23 = smov [#allocation6]  }
  0x1e   : > { %p416_p13 = pnand %p414_p12, %p402_p11  ;;  %s418_s26 = sshll.u32 %s515_s23, 4  ;;  %s419_s26 = int_to_ptr.vmem [resolvable:$false] %s418_s26 }
  0x1f   : > { %s420_s29 = scalar_lea.vmem %s419_s26, 256  ;;  %p421_p10 = scmp.lt.s32.totalorder %s148_s16, %s419_s26 }
  0x20   : > { %p417_p0 = pneg %p416_p13  ;;  %p422_p9 = scmp.lt.s32.totalorder %s420_s29, %s413_s25 }
  0x22   : > { %p423_p6 = por %p422_p9, %p421_p10 }
  0x24   : > { %p424_p5 = pnand %p423_p6, %p417_p0 }
  0x26   : > { %427 = shalt.err (!%p424_p5)
}
  0x27   : > { %331 = dma.hbm_to_vmem [thread:$0]  (!%p628_p2), %s145_s8, 128, %s148_s16, %s136_s24  }
  0x28   : > { %156 = sbr.rel (%p586_p8) target bundleno = 77 (0x4d), region = 28 }
  0x2d   : > { %479 = dma.done.wait (%p566_p1), [#allocation5], 16  }
  0x2e   : > { %481 = vsyncadd (%p566_p1), [#allocation5], 4294967280  ;;  %s643_s27 = sand.u32 1, %s496_s10  }
  0x2f   : > { %s310_s30 = sshll.u32 %s643_s27, 3  ;;  %s163_s3 = scalar_lea.sflag [#allocation3], %s643_s27 }
  0x30   : > { %s166_s5 = scalar_lea.vmem [#allocation6], %s310_s30 }
  0x31   : > { %483 = dma.done.wait (%p576_p4), %s163_s3, 128  }
  0x32   : > { %485 = vsyncadd (%p576_p4), %s163_s3, 4294967168 }
  0x33   : > { %171 = sfence }
  0x34   : > { %s188_s17 = sld [smem:[#allocation2 + %s504_s12]]  ;;  %v189_v0 = vld [vmem:[%s166_s5] sm:$0xff]  ;;  %s187_s21 = scalar_lea.vmem [#allocation7], %s310_s30  ;;  %vm192_vm0 = vcmask 261120  }
  0x35   : > { %s209_s6 = sshll.u32 %s187_s21, 4  ;;  %s313_s7 = sshll.u32 %s504_s12, 7  ;;  %s210_s6 = int_to_ptr.vmem [resolvable:$true] %s209_s6 }
  0x36   : > { %s207_s16 = scalar_lea.hbm %s694_s2, %s313_s7  ;;  %s195_s19 = scalar_lea.sflag [#allocation4], %s643_s27 }
  0x37   : > { %s428_s18 = scalar_lea.vmem %s210_s6, 128  ;;  %p704_p4 = scmp.ne.s32.totalorder %s702_s28, 0 }
  0x38   : > { %p429_p1 = scmp.ne.s32.totalorder %s210_s6, %s428_s18  ;;  %s516_s24 = smov [#allocation7]  }
  0x39   : > { %s432_s25 = sshll.u32 %s516_s24, 4  ;;  %s433_s25 = int_to_ptr.vmem [resolvable:$false] %s432_s25 }
  0x3a   : > { %v190_v1 = vstv %s188_s17  ;;  %p430_p6 = pnand %p429_p1, %p704_p4  ;;  %s434_s23 = scalar_lea.vmem %s433_s25, 256 }
  0x3b   : > { %v191_v2 = vmul.f32 %v190_v1, %v189_v0  ;;  %p435_p9 = scmp.lt.s32.totalorder %s210_s6, %s433_s25  ;;  %p436_p3 = scmp.lt.s32.totalorder %s434_s23, %s428_s18 }
  0x3c   : > { %p431_p8 = pneg %p430_p6 }
  0x3d   : > { %193 = vst.msk [vmem:[%s187_s21] sm:$0xff] %vm192_vm0, %v191_v2  ;;  %p437_p5 = por %p436_p3, %p435_p9 }
  0x3f   : > { %p438_p7 = pnand %p437_p5, %p431_p8 }
  0x41   : > { %441 = shalt.err (!%p438_p7)
}
  0x42   : > { %s442_s12 = scalar_lea.hbm %s207_s16, 128  ;;  %s446_s27 = scalar_lea.hbm %s694_s2, 256 }
  0x43   : > { %p443_p2 = scmp.ne.s32.totalorder %s207_s16, %s442_s12  ;;  %p447_p13 = scmp.lt.s32.totalorder %s207_s16, %s694_s2 }
  0x44   : > { %p448_p0 = scmp.lt.s32.totalorder %s446_s27, %s442_s12 }
  0x45   : > { %p444_p11 = pnand %p443_p2, %p704_p4 }
  0x46   : > { %p449_p10 = por %p448_p0, %p447_p13 }
  0x47   : > { %p445_p12 = pneg %p444_p11 }
  0x49   : > { %p450_p1 = pnand %p449_p10, %p445_p12 }
  0x4b   : > { %453 = shalt.err (!%p450_p1)
}
  0x4c   : > { %322 = dma.vmem_to_hbm [thread:$0]  (%p704_p4), %s210_s6, 128, %s207_s16, %s195_s19  }
  0x4d PF: > { %s221_s5 = sand.u32 1, %s492_s9   ;;  %p705_p6 = scmp.ne.s32.totalorder %s699_s20, 0 }
  0x4e   : > { %p706_p8 = scmp.ge.s32.totalorder %s512_s14, 2  ;;  %s222_s17 = scalar_lea.sflag [#allocation4], %s221_s5 }
  0x50   : > { %p333_p9 = pnand %p706_p8, %p705_p6 }
  0x52   : > { %p334_p3 = pneg %p333_p9 }
  0x54   : > { %487 = dma.done.wait (%p334_p3), %s222_s17, 128  }
  0x55   : > { %489 = vsyncadd (%p334_p3), %s222_s17, 4294967168  ;;  %s19_s14 = sadd.s32 1, %s512_s14   ;;  %s707_s9 = smov %s496_s10 }
  0x56   : > { %p16_p5 = scmp.ge.s32.totalorder %s19_s14, 4   ;;  %s708_s10 = smov %s500_s11 }
  0x57   : > { %s709_s11 = smov %s620_s4  ;;  %s710_s12 = smov %s508_s13 }
  0x58   : > { %s711_s13 = smov %s713_s22  ;;  %18 = sbr.rel (!%p16_p5) target bundleno = 7 (0x7), region = 78 }
  0x5d   :  { %227 = vsyncpa [#allocation3], 1 }
  0x5e   :  { %229 = vsyncpa [#allocation3 + $0x1], 1 }
  0x5f   :  { %230 = vsyncpa [#allocation4], 1 }
  0x60   :  { %232 = vsyncpa [#allocation4 + $0x1], 1 }
  0x61   :  { %233 = vsyncpa [#allocation5], 1 }
  0x62   :  { %235 = vsyncpa [#allocation5 + $0x1], 1 }

</bundles_post_ra>
